<compile_context>
chip_gen: v7x
topology: tpu7x:2x2x1
jax: 0.10.0
libtpu: 0.0.40
codegen_flags: <defaults>
</compile_context>

<pallas_src>
import functools

import jax
import jax.numpy as jnp
from jax.experimental import pallas as pl
from jax.experimental.pallas import tpu as pltpu

_LANE = 128


def _sublane(itemsize):
    # 8 for f32, 16 for bf16, 32 for int8 (sub-32-bit packs along sublanes).
    return max(8, 32 // itemsize)


def _tile_budget_bytes():
    """Per-buffer tile byte target, generation-aware.

    in + out are each double-buffered (4 live buffers).  2 MiB/buffer stays
    under v5e's 16 MiB scoped-VMEM default; on a v7x-class part (64 MiB
    physical VMEM but ~3.2 TB/s HBM) a 2 MiB tile is only ~1.3 us of DMA so
    we go to 4 MiB/buffer (16 MiB total, still under the 32 MiB scoped
    default)."""
    try:
        vmem = pltpu.get_tpu_info().vmem_capacity_bytes
    except Exception:  # emulator / older jax: conservative default
        vmem = 128 * 1024 * 1024
    if vmem <= 64 * 1024 * 1024:
        return 4 * 1024 * 1024
    return 2 * 1024 * 1024


def _pick_tile(dim, unit, cap_elems):
    """Largest multiple of `unit` that divides `dim` and is <= cap_elems.

    `dim` is guaranteed to be a multiple of `unit` (wrapper pads first), so
    the result is always a clean divisor and the grid is exact."""
    cap = max(unit, (cap_elems // unit) * unit)
    cap = min(cap, dim)
    best = unit
    t = unit
    while t <= cap:
        if dim % t == 0:
            best = t
        t += unit
    return best


def _pad_to(dim, unit):
    return ((dim + unit - 1) // unit) * unit


def _bias_add_kernel(b_ref, x_ref, o_ref):
    # b_ref: (TR, 1) per-row bias; x_ref / o_ref: (TR, THW) tiles.
    # Implicit broadcast on the VPU; the kernel is HBM-DMA bound so this is
    # free filler.
    o_ref[...] = x_ref[...] + b_ref[...]


def learnable_bias_forward(x, bias, *, donate=False):
    """x: (N, C, H, W); bias: (1, C, 1, 1).  Returns x + bias (broadcast).

    donate=True wires input_output_aliases so the output reuses x's HBM
    buffer (pair with jit donation of x for a true in-place update)."""
    N, C, H, W = x.shape
    HW = H * W
    rows = N * C
    dtype = x.dtype
    itemsize = jnp.dtype(dtype).itemsize
    sub = _sublane(itemsize)

    # Flatten (N, C) -> one sublane axis; H*W -> lane-dense axis.
    x2 = x.reshape(rows, HW)
    b2 = jnp.tile(bias.reshape(C).astype(dtype), N).reshape(rows, 1)

    # Pad to sublane/lane multiples (sliced off after the kernel) so every
    # block is (mult-of-sub, mult-of-128) and stores are unmasked.
    rows_p = _pad_to(rows, sub)
    hw_p = _pad_to(HW, _LANE)
    padded = (rows_p != rows) or (hw_p != HW)
    if padded:
        x2 = jnp.pad(x2, ((0, rows_p - rows), (0, hw_p - HW)))
        b2 = jnp.pad(b2, ((0, rows_p - rows), (0, 0)))

    budget_elems = _tile_budget_bytes() // itemsize
    # Cap THW so that even the minimum TR (= sub) keeps TR*THW within budget.
    thw = _pick_tile(hw_p, _LANE, max(_LANE, budget_elems // sub))
    tr = _pick_tile(rows_p, sub, max(sub, budget_elems // thw))

    grid = (rows_p // tr, hw_p // thw)

    cost = pl.CostEstimate(
        flops=rows_p * hw_p,
        transcendentals=0,
        bytes_accessed=(2 * rows_p * hw_p + rows_p * grid[1]) * itemsize,
    )

    out2 = pl.pallas_call(
        _bias_add_kernel,
        out_shape=jax.ShapeDtypeStruct((rows_p, hw_p), dtype),
        grid=grid,
        in_specs=[
            # per-row bias slice (last dim == full array dim 1 -> legal block)
            pl.BlockSpec((tr, 1), lambda r, s: (r, 0)),
            # lane-dense (TR, THW) tile of the flattened activation
            pl.BlockSpec((tr, thw), lambda r, s: (r, s)),
        ],
        out_specs=pl.BlockSpec((tr, thw), lambda r, s: (r, s)),
        compiler_params=pltpu.CompilerParams(
            dimension_semantics=("parallel", "parallel")),
        cost_estimate=cost,
        input_output_aliases={1: 0} if donate else {},
    )(b2, x2)

    if padded:
        out2 = out2[:rows, :HW]
    return out2.reshape(N, C, H, W)


if __name__ == "__main__":
    key = jax.random.PRNGKey(0)
    kx, kb, kx2, kb2 = jax.random.split(key, 4)

    # Aligned case: rows = N*C = 8 (sublane multiple), HW = 256 (lane multiple).
    N, C, H, W = 2, 4, 16, 16
    x = jax.random.normal(kx, (N, C, H, W), dtype=jnp.float32)
    bias = 0.1 * jax.random.normal(kb, (1, C, 1, 1), dtype=jnp.float32)
    ref = x + bias  # JAX broadcasting == PyTorch expand_as + add

    out = jax.block_until_ready(learnable_bias_forward(x, bias))
    assert out.shape == x.shape and out.dtype == x.dtype
    assert jnp.allclose(out, ref, atol=1e-6, rtol=1e-6)

    # Same case with the output aliased onto x's (donated) buffer.
    fwd_inplace = jax.jit(
        functools.partial(learnable_bias_forward, donate=True),
        donate_argnums=0)
    out_d = jax.block_until_ready(fwd_inplace(x, bias))
    assert jnp.allclose(out_d, ref, atol=1e-6, rtol=1e-6)
    del x  # x was donated above; do not reuse it.

    # Unaligned case: exercises the pad-to-(sublane,128)-and-slice path.
    N2, C2, H2, W2 = 2, 3, 5, 7
    x_u = jax.random.normal(kx2, (N2, C2, H2, W2), dtype=jnp.float32)
    bias_u = 0.1 * jax.random.normal(kb2, (1, C2, 1, 1), dtype=jnp.float32)
    out_u = jax.block_until_ready(learnable_bias_forward(x_u, bias_u))
    assert out_u.shape == x_u.shape
    assert jnp.allclose(out_u, x_u + bias_u, atol=1e-6, rtol=1e-6)

    print("KERNEL_OK")
</pallas_src>

<mosaic_0001>
module attributes {stable_mosaic.version = 11 : i64} {
  func.func @_bias_add_kernel(%arg0: i32, %arg1: i32, %arg2: memref<8x1xf32, #tpu.memory_space<vmem>>, %arg3: memref<8x256xf32, #tpu.memory_space<vmem>>, %arg4: memref<8x256xf32, #tpu.memory_space<vmem>>) attributes {dimension_semantics = [#tpu.dimension_semantics<parallel>, #tpu.dimension_semantics<parallel>], iteration_bounds = array<i64: 1, 1>, scalar_prefetch = 0 : i64, scratch_operands = 0 : i64, tpu.core_type = #tpu.core_type<tc>, window_params = [{transform_indices = @transform_0, window_bounds = array<i64: 8, 1>}, {transform_indices = @transform_1, window_bounds = array<i64: 8, 256>}, {transform_indices = @transform_2, window_bounds = array<i64: 8, 256>}]} {
    %c0 = arith.constant 0 : index
    %c0_0 = arith.constant 0 : index
    %0 = vector.load %arg3[%c0, %c0_0] : memref<8x256xf32, #tpu.memory_space<vmem>>, vector<8x256xf32>
    %c0_1 = arith.constant 0 : index
    %c0_2 = arith.constant 0 : index
    %1 = vector.load %arg2[%c0_1, %c0_2] : memref<8x1xf32, #tpu.memory_space<vmem>>, vector<8x1xf32>
    %2 = vector.broadcast %1 : vector<8x1xf32> to vector<8x256xf32>
    %3 = arith.addf %0, %2 : vector<8x256xf32>
    %c0_3 = arith.constant 0 : index
    %c0_4 = arith.constant 0 : index
    %4 = vector.load %arg4[%c0_3, %c0_4] : memref<8x256xf32, #tpu.memory_space<vmem>>, vector<8x256xf32>
    tpu.vector_store %arg4[%c0_3, %c0_4], %3 {strides = array<i32>} : memref<8x256xf32, #tpu.memory_space<vmem>>, vector<8x256xf32>,
    return
  }
  func.func @transform_0(%arg0: i32, %arg1: i32) -> (i32, i32) {
    %c0_i32 = arith.constant 0 : i32
    %c0_i32_0 = arith.constant 0 : i32
    return %arg0, %c0_i32 : i32, i32
  }
  func.func @transform_1(%arg0: i32, %arg1: i32) -> (i32, i32) {
    %c0_i32 = arith.constant 0 : i32
    return %arg0, %arg1 : i32, i32
  }
  func.func @transform_2(%arg0: i32, %arg1: i32) -> (i32, i32) {
    %c0_i32 = arith.constant 0 : i32
    return %arg0, %arg1 : i32, i32
  }
}

</mosaic_0001>

<bundles_post_ra>
// kernel: tpu_custom_call.1
= control target key start
LH: loop header
LB: loop body
LE: loop exit
PB: predicated region body
PF: predicated region fallthrough
CT: control target
= control target key end

     0   :  { %7 = vsyncpa [#allocation3], 0  ;;  %s148_s0 = inlined_call_operand.vmem [shape: f32[8,1], index: 0, kind: input, shape index: {}]   ;;  %s149_s1 = inlined_call_operand.hbm [shape: f32[8,256], index: 1, kind: input, shape index: {}]   ;;  %s150_s2 = inlined_call_operand.hbm [shape: f32[8,256], index: 2, kind: output, shape index: {}]  }
   0x1   :  { %8 = vsyncpa [#allocation4], 0  ;;  %s103_s9 = smov [#allocation2]   ;;  %s55_s13 = scalar_lea.hbm %s149_s1, 256 }
   0x2   :  { %s17_s10 = sshll.u32 %s103_s9, 4  ;;  %p56_p0 = scmp.ne.s32.totalorder %s149_s1, %s55_s13  ;;  %s18_s10 = int_to_ptr.vmem [resolvable:$true] %s17_s10 }
   0x3   :  { %p59_p1 = scmp.lt.u32.totalorder %s55_s13, %s149_s1 }
   0x5   :  { %p61_p2 = pnand %p59_p1, %p56_p0 }
   0x7   :  { %64 = shalt.err (!%p61_p2)
}
   0x8   :  { %s65_s18 = scalar_lea.vmem %s18_s10, 256  ;;  %p70_p4 = scmp.lt.s32.totalorder %s18_s10, %s18_s10 }
   0x9   :  { %p66_p3 = scmp.ne.s32.totalorder %s18_s10, %s65_s18  ;;  %p71_p5 = scmp.lt.s32.totalorder %s65_s18, %s65_s18 }
   0xb   :  { %p72_p6 = por %p71_p5, %p70_p4 }
   0xd   :  { %p73_p7 = pnand %p72_p6, %p66_p3 }
   0xf   :  { %76 = shalt.err (!%p73_p7)
}
  0x10   :  { %20 = dma.hbm_to_vmem [thread:$0]  %s149_s1, 256, %s18_s10, [#allocation3]  }
  0x11   :  { %99 = dma.done.wait [#allocation3], 256  }
  0x12   :  { %100 = vsyncadd [#allocation3], 4294967040  ;;  %v104_v0 = vmov 0   ;;  %v26_v1 = vld [vmem:[%s148_s0] sm:$0xff]  ;;  %v25_v3 = vld [vmem:[#allocation2 + $0x8] sm:$0xff]  ;;  %s105_s23 = smov [#allocation5]  }
  0x13   :  { %54 = vset.pattern.permute.xlu0 %v104_v0  ;;  %v24_v2 = vld [vmem:[#allocation2] sm:$0xff]  ;;  %s42_s24 = sshll.u32 %s105_s23, 4  ;;  %s43_s24 = int_to_ptr.vmem [resolvable:$true] %s42_s24 }
  0x14   :  { %29 = vperm.xlu0 %54, %v26_v1   ;;  %s77_s1 = scalar_lea.vmem %s43_s24, 256  ;;  %p82_p9 = scmp.lt.s32.totalorder %s43_s24, %s43_s24 }
  0x15   :  { %p78_p8 = scmp.ne.s32.totalorder %s43_s24, %s77_s1  ;;  %p83_p10 = scmp.lt.s32.totalorder %s77_s1, %s77_s1 }
  0x17   :  { %p84_p11 = por %p83_p10, %p82_p9 }
  0x19   :  { %p85_p12 = pnand %p84_p11, %p78_p8 }
  0x93   :  { %v30_v4 = vpop.permute.xlu0 %29 }
  0x94   :  { %v32_v5 = vadd.f32 %v30_v4, %v24_v2  ;;  %v33_v6 = vadd.f32 %v30_v4, %v25_v3 }
  0x96   :  { %34 = vst [vmem:[#allocation5] sm:$0xff] %v32_v5  ;;  %35 = vst [vmem:[#allocation5 + $0x8] sm:$0xff] %v33_v6 }
  0x97   :  { %88 = shalt.err (!%p85_p12)
}
  0x98   :  { %s89_s26 = scalar_lea.hbm %s150_s2, 256 }
  0x99   :  { %p90_p13 = scmp.ne.s32.totalorder %s150_s2, %s89_s26  ;;  %p93_p0 = scmp.lt.u32.totalorder %s89_s26, %s150_s2 }
  0x9b   :  { %p95_p1 = pnand %p93_p0, %p90_p13 }
  0x9d   :  { %98 = shalt.err (!%p95_p1)
}
  0x9e   :  { %45 = dma.vmem_to_hbm [thread:$0]  %s43_s24, 256, %s150_s2, [#allocation4]  }
  0x9f   :  { %101 = dma.done.wait [#allocation4], 256  }
  0xa0   :  { %102 = vsyncadd [#allocation4], 4294967040 }
  0xa1   :  { %49 = vsyncpa [#allocation3], 1 }
  0xa2   :  { %50 = vsyncpa [#allocation4], 1 }

</bundles_post_ra>
